<compile_context>
chip_gen: v6e
topology: v6e:2x2x1
jax: 0.10.0
libtpu: 0.0.40
codegen_flags: <defaults>
</compile_context>

<pallas_src>
import functools

import numpy as np

import jax
import jax.numpy as jnp
from jax.experimental import pallas as pl
from jax.experimental.pallas import tpu as pltpu


def conv1d_deriv_kernel(x_ref, o_ref, *, taps, l_out):
    """Cross-correlation with static taps along the lane axis.

    x_ref : VMEM (block_n, L)     f32 input tile
    o_ref : VMEM (block_n, l_out) f32 output tile
    taps  : static tuple of (offset, weight/resol) with weight != 0
    """
    x = x_ref[...]
    acc = None
    for k, w in taps:
        # Static lane slice; Mosaic lowers the unaligned offset to a lane
        # rotate (XLU), so only one shifted term is live at a time.
        term = x[:, k:k + l_out] * w
        acc = term if acc is None else acc + term
    o_ref[...] = acc.astype(o_ref.dtype)


def _round_up(x, m):
    return (x + m - 1) // m * m


def _cdiv(a, b):
    return (a + b - 1) // b


def _vmem_capacity_bytes():
    """Physical VMEM per core; conservative (v7x) fallback if unqueryable."""
    try:
        info = pltpu.get_tpu_info()
        cap = int(getattr(info, "vmem_capacity_bytes", 0))
        if cap > 0:
            return cap
    except Exception:  # e.g. interpret mode / no TPU visible at trace time
        pass
    return 64 * 1024 * 1024


def conv1d_derivative(x, der_filter, resol):
    """Equivalent of Conv1dDerivative.forward.

    x          : (N, 1, L)  float32   (PyTorch NCL layout)
    der_filter : (1, 1, K)  fixed filter weights (non-trainable)
    resol      : python float
    returns    : (N, 1, L - K + 1) float32
    """
    n, c, length = x.shape
    assert c == 1, "Conv1dDerivative uses a single input channel"
    w_host = np.asarray(der_filter, dtype=np.float32).reshape(-1)
    k = int(w_host.shape[0])
    l_out = length - k + 1
    assert l_out >= 1, "input too short for the filter"

    # Static taps with 1/resol folded in; drop exact zeros (e.g. [-1, 0, 1]).
    inv_resol = 1.0 / float(resol)
    taps = tuple(
        (i, float(wi) * inv_resol) for i, wi in enumerate(w_host) if float(wi) != 0.0
    )
    if not taps:
        # All-zero filter: no kernel launch needed.
        return jnp.zeros((n, 1, l_out), jnp.float32)

    x2d = jnp.asarray(x, dtype=jnp.float32).reshape(n, length)

    # ---- Per-generation VMEM budget -------------------------------------
    cap = _vmem_capacity_bytes()
    if cap <= 64 * 1024 * 1024:          # v7x-class parts (64 MiB VMEM)
        vmem_limit = 40 * 1024 * 1024
    else:                                 # v5e / v6e (128 MiB VMEM)
        vmem_limit = 96 * 1024 * 1024
    vmem_limit = min(vmem_limit, cap - 8 * 1024 * 1024)

    # Per-row footprint: double-buffered input + output tiles, plus in-kernel
    # temporaries (materialized x, one shifted term, the accumulator).
    io_bytes_per_row = 2 * (length + l_out) * 4
    tmp_bytes_per_row = 3 * length * 4
    per_row = io_bytes_per_row + tmp_bytes_per_row
    budget = max(per_row * 8, vmem_limit - 2 * 1024 * 1024)

    block_n = max(8, (budget // per_row) // 8 * 8)

    n8 = _round_up(n, 8)
    block_n = min(block_n, n8)
    g = _cdiv(n8, block_n)
    # Keep >= 2 grid steps when there are enough rows so v7x's two
    # TensorCores both get work under dimension_semantics=("parallel",).
    if n8 >= 16 and g < 2:
        g = 2
    block_n = _round_up(_cdiv(n8, g), 8)
    n_pad = g * block_n

    # If even a single 8-row tile exceeds the default limit (very long L),
    # raise the limit instead of failing at compile time.
    min_need = 8 * per_row + 2 * 1024 * 1024
    if min_need > vmem_limit:
        vmem_limit = min(cap - 4 * 1024 * 1024, min_need)
    # TODO(synk): for very long L (and skinny N), add a 2D grid over
    # (rows, L-chunks) with a K-1 halo on the input chunk to keep tiles in the
    # 4-8 MiB sweet spot instead of growing vmem_limit.

    if n_pad > n:
        # Row-only padding (never the lane axis); no-op for aligned N.
        x2d = jnp.pad(x2d, ((0, n_pad - n), (0, 0)))

    out2d = pl.pallas_call(
        functools.partial(conv1d_deriv_kernel, taps=taps, l_out=l_out),
        out_shape=jax.ShapeDtypeStruct((n_pad, l_out), jnp.float32),
        grid=(n_pad // block_n,),
        in_specs=[pl.BlockSpec((block_n, length), lambda i: (i, 0))],
        out_specs=pl.BlockSpec((block_n, l_out), lambda i: (i, 0)),
        compiler_params=pltpu.CompilerParams(
            dimension_semantics=("parallel",),
            vmem_limit_bytes=int(vmem_limit),
        ),
        cost_estimate=pl.CostEstimate(
            flops=2 * len(taps) * n * l_out,
            transcendentals=0,
            bytes_accessed=4 * (n * length + n * l_out),
        ),
    )(x2d)

    if n_pad > n:
        out2d = out2d[:n]
    return out2d.reshape(n, 1, l_out)


if __name__ == "__main__":
    # Mirrors nn.Conv1d(1, 1, 3, bias=False) with a fixed central-difference
    # DerFilter, as used in the PDE loss generator.
    kernel_size = 3
    der_filter = jnp.array([[[-1.0, 0.0, 1.0]]], dtype=jnp.float32)  # (1,1,3)
    dx = 0.05
    resol = 2.0 * dx  # derivative / (2*dx)

    # Small deterministic input: batch=2, channels=1, length=16.
    key = jax.random.PRNGKey(0)
    x = jax.random.normal(key, (2, 1, 16), dtype=jnp.float32)

    out = conv1d_derivative(x, der_filter, resol)
    out = jax.block_until_ready(out)

    # Pure-JAX reference (cross-correlation, valid padding, / resol).
    w = der_filter.reshape(kernel_size)
    l_out = x.shape[-1] - kernel_size + 1
    ref = sum(w[k] * x[:, :, k:k + l_out] for k in range(kernel_size)) / resol

    assert out.shape == (2, 1, l_out), out.shape
    assert jnp.allclose(out, ref, atol=1e-5, rtol=1e-5), (
        float(jnp.max(jnp.abs(out - ref)))
    )
    print("KERNEL_OK")
</pallas_src>

<mosaic_0001>
module attributes {stable_mosaic.version = 11 : i64} {
  func.func @conv1d_deriv_kernel(%arg0: i32, %arg1: memref<8x16xf32, #tpu.memory_space<vmem>>, %arg2: memref<8x14xf32, #tpu.memory_space<vmem>>) attributes {dimension_semantics = [#tpu.dimension_semantics<parallel>], iteration_bounds = array<i64: 1>, scalar_prefetch = 0 : i64, scratch_operands = 0 : i64, tpu.core_type = #tpu.core_type<tc>, window_params = [{transform_indices = @transform_0, window_bounds = array<i64: 8, 16>}, {transform_indices = @transform_1, window_bounds = array<i64: 8, 14>}]} {
    %c0 = arith.constant 0 : index
    %c0_0 = arith.constant 0 : index
    %0 = vector.load %arg1[%c0, %c0_0] : memref<8x16xf32, #tpu.memory_space<vmem>>, vector<8x16xf32>
    %1 = vector.extract_strided_slice %0 {offsets = [0, 0], sizes = [8, 14], strides = [1, 1]} : vector<8x16xf32> to vector<8x14xf32>
    %cst = arith.constant -1.000000e+01 : f32
    %2 = vector.broadcast %cst : f32 to vector<8x14xf32>
    %3 = arith.mulf %1, %2 : vector<8x14xf32>
    %4 = vector.extract_strided_slice %0 {offsets = [0, 2], sizes = [8, 14], strides = [1, 1]} : vector<8x16xf32> to vector<8x14xf32>
    %cst_1 = arith.constant 1.000000e+01 : f32
    %5 = vector.broadcast %cst_1 : f32 to vector<8x14xf32>
    %6 = arith.mulf %4, %5 : vector<8x14xf32>
    %7 = arith.addf %3, %6 : vector<8x14xf32>
    %c0_2 = arith.constant 0 : index
    %c0_3 = arith.constant 0 : index
    %8 = vector.load %arg2[%c0_2, %c0_3] : memref<8x14xf32, #tpu.memory_space<vmem>>, vector<8x14xf32>
    tpu.vector_store %arg2[%c0_2, %c0_3], %7 {strides = array<i32>} : memref<8x14xf32, #tpu.memory_space<vmem>>, vector<8x14xf32>,
    return
  }
  func.func @transform_0(%arg0: i32) -> (i32, i32) {
    %c0_i32 = arith.constant 0 : i32
    %c0_i32_0 = arith.constant 0 : i32
    return %arg0, %c0_i32 : i32, i32
  }
  func.func @transform_1(%arg0: i32) -> (i32, i32) {
    %c0_i32 = arith.constant 0 : i32
    %c0_i32_0 = arith.constant 0 : i32
    return %arg0, %c0_i32 : i32, i32
  }
}

</mosaic_0001>

<bundles_post_ra>
// kernel: tpu_custom_call.1
= control target key start
LH: loop header
LB: loop body
LE: loop exit
PB: predicated region body
PF: predicated region fallthrough
CT: control target
= control target key end

     0   :  { %6 = vsyncpa [#allocation3], 0  ;;  %s112_s0 = inlined_call_operand.hbm [shape: f32[8,16], index: 0, kind: input, shape index: {}]   ;;  %s113_s1 = inlined_call_operand.hbm [shape: f32[8,14], index: 1, kind: output, shape index: {}]  }
   0x1   :  { %7 = vsyncpa [#allocation4], 0  ;;  %s93_s6 = smov [#allocation2]  }
   0x2   :  { %s14_s7 = sshll.u32 %s93_s6, 4  ;;  %s15_s7 = int_to_ptr.vmem [resolvable:$true] %s14_s7 }
   0x3   :  { %s57_s8 = scalar_lea.vmem %s15_s7, 128  ;;  %p62_p1 = scmp.lt.s32.totalorder %s15_s7, %s15_s7 }
   0x4   :  { %p58_p0 = scmp.ne.s32.totalorder %s15_s7, %s57_s8  ;;  %p63_p2 = scmp.lt.s32.totalorder %s57_s8, %s57_s8 }
   0x6   :  { %p64_p3 = por %p63_p2, %p62_p1 }
   0x8   :  { %p65_p4 = pnand %p64_p3, %p58_p0 }
   0xa   :  { %68 = shalt.err (!%p65_p4)
}
   0xb   :  { %17 = dma.hbm_to_vmem [thread:$0]  %s112_s0, 128, %s15_s7, [#allocation3]  }
   0xc   :  { %89 = dma.done.wait [#allocation3], 128  }
   0xd   :  { %90 = vsyncadd [#allocation3], 4294967168  ;;  %v21_v0 = vld [vmem:[#allocation2] sm:$0xff]  ;;  %s94_s11 = smov 126   ;;  %s95_s12 = smov [#allocation5]   ;;  %vm29_vm0 = vcmask 113664  }
   0xe   :  { %v23_v1 = vmul.f32 10.0, %v21_v0  ;;  %v22_v2 = vmul.f32 -10.0, %v21_v0  ;;  %s37_s13 = sshll.u32 %s95_s12, 4  ;;  %s38_s13 = int_to_ptr.vmem [resolvable:$true] %s37_s13 }
   0xf   :  { %s69_s14 = scalar_lea.vmem %s38_s13, 128  ;;  %p74_p6 = scmp.lt.s32.totalorder %s38_s13, %s38_s13 }
  0x10   :  { %25 = vrot.lane.b32.xlu0 %v23_v1, %s94_s11  ;;  %p70_p5 = scmp.ne.s32.totalorder %s38_s13, %s69_s14  ;;  %p75_p7 = scmp.lt.s32.totalorder %s69_s14, %s69_s14 }
  0x12   :  { %p76_p8 = por %p75_p7, %p74_p6 }
  0x14   :  { %p77_p9 = pnand %p76_p8, %p70_p5 }
  0x82   :  { %v26_v3 = vpop.permute.xlu0 %25 }
  0x83   :  { %v28_v4 = vadd.f32 %v26_v3, %v22_v2 }
  0x85   :  { %30 = vst.msk [vmem:[#allocation5] sm:$0xff] %vm29_vm0, %v28_v4 }
  0x86   :  { %80 = shalt.err (!%p77_p9)
}
  0x87   :  { %40 = dma.vmem_to_hbm [thread:$0]  %s38_s13, 128, %s113_s1, [#allocation4]  }
  0x88   :  { %91 = dma.done.wait [#allocation4], 128  }
  0x89   :  { %92 = vsyncadd [#allocation4], 4294967168 }
  0x8a   :  { %44 = vsyncpa [#allocation3], 1 }
  0x8b   :  { %45 = vsyncpa [#allocation4], 1 }

</bundles_post_ra>
